<compile_context>
chip_gen: v7x
topology: tpu7x:2x2x1
jax: 0.10.0
libtpu: 0.0.40
codegen_flags: <defaults>
</compile_context>

<pallas_src>
import math

import jax
import jax.numpy as jnp
from jax.experimental import pallas as pl
from jax.experimental.pallas import tpu as pltpu


def _linear_ae_kernel(x_ref, y_ref, w1_ref, w2_ref, beff_ref, o_ref):
    # z = flatten(x) + flatten(y)                              (tm, d)
    z = x_ref[...] + y_ref[...]
    # first linear (bias folded into beff): (tm, d) @ (d, nb_pad) -> (tm, nb_pad)
    h = jnp.dot(z.astype(w1_ref.dtype), w1_ref[...],
                preferred_element_type=jnp.float32)
    # second linear: (tm, nb_pad) @ (nb_pad, d) + (1, d) -> (tm, d)
    out = jnp.dot(h.astype(w2_ref.dtype), w2_ref[...],
                  preferred_element_type=jnp.float32) + beff_ref[...]
    o_ref[...] = out.astype(o_ref.dtype)


def _round_up(x, m):
    return ((x + m - 1) // m) * m


def _cdiv(a, b):
    return (a + b - 1) // b


def _vmem_budget_and_limit():
    """Generation-aware VMEM budget (for tile sizing) and scoped limit."""
    try:
        cap = int(pltpu.get_tpu_info().vmem_capacity_bytes)
    except Exception:
        cap = 64 * 1024 * 1024  # conservative (v7x-sized) fallback
    limit = int(cap * 0.875)    # ~112 MiB on 128-MiB parts, ~56 MiB on v7x
    budget = int(limit * 0.85)  # headroom for Mosaic internal scratch
    return budget, limit


def _choose_tiling(B, per_row_bytes, weight_bytes, budget):
    """Pick (tm, n_tiles): largest batch tile fitting the VMEM budget, with
    tiles covering B (ragged last tile allowed) and >=2 tiles when B >= 16 so
    both v7x TensorCores get work."""
    remaining = budget - weight_bytes
    if remaining < 8 * per_row_bytes:
        raise ValueError(
            f"Resident W1/W2/bias need {weight_bytes} bytes, leaving too little "
            f"of the {budget}-byte VMEM budget for activation tiles. "
            "TODO(synk): add a K-tiling grid axis over d for this regime.")
    tm_cap = 1024 if budget >= 80 * 1024 * 1024 else 512
    tm_fit = max(8, min(tm_cap, (remaining // per_row_bytes) // 8 * 8))
    want_tiles = 2 if B >= 16 else 1
    n_tiles = max(want_tiles, _cdiv(B, tm_fit))
    if n_tiles == 1:
        return B, 1  # single exact tile; block dim == full array dim is legal
    tm = min(tm_fit, _round_up(_cdiv(B, n_tiles), 8))
    return tm, _cdiv(B, tm)


def linear_ae_m_loc(x, y, w1_t, b1, w2_t, b2, *, mxu_dtype=None):
    """x, y: (B, C, H, W). w1_t: (d, nb), b1: (1, nb), w2_t: (nb, d), b2: (1, d).

    mxu_dtype=jnp.bfloat16 feeds the MXU bf16 operands (recommended on v5e);
    default None keeps exact f32 numerics.
    """
    B = x.shape[0]
    d = int(math.prod(x.shape[1:]))
    nb = w1_t.shape[1]

    # Fold the first bias through the second layer (exact up to f32 rounding):
    #   (z@W1 + b1)@W2 + b2 == (z@W1)@W2 + (b1@W2 + b2)
    b_eff = (b1.reshape(1, nb).astype(jnp.float32) @ w2_t.astype(jnp.float32)
             + b2.reshape(1, d).astype(jnp.float32))

    # Lane-pad the bottleneck to a multiple of 128 (zero padding is exact).
    nb_pad = _round_up(nb, 128)
    if nb_pad != nb:
        w1_t = jnp.pad(w1_t, ((0, 0), (0, nb_pad - nb)))
        w2_t = jnp.pad(w2_t, ((0, nb_pad - nb), (0, 0)))
    if mxu_dtype is not None:
        w1_t = w1_t.astype(mxu_dtype)
        w2_t = w2_t.astype(mxu_dtype)

    budget, vmem_limit = _vmem_budget_and_limit()

    in_sz = jnp.dtype(x.dtype).itemsize
    out_sz = in_sz
    w_sz = jnp.dtype(w1_t.dtype).itemsize
    # Resident (single-buffered) weights + fused bias.
    weight_bytes = w_sz * 2 * d * nb_pad + 4 * d
    # Per-row bytes: x, y double-buffered tiles + out double-buffered tile
    # + z temp (f32) + f32 staging of out before astype + h temp.
    per_row = (2 * 2 * in_sz + 2 * out_sz + 4 + 4) * d + 4 * nb_pad

    tm, n_tiles = _choose_tiling(B, per_row, weight_bytes, budget)

    x_flat = x.reshape(B, d)
    y_flat = y.reshape(B, d)

    out_flat = pl.pallas_call(
        _linear_ae_kernel,
        out_shape=jax.ShapeDtypeStruct((B, d), x.dtype),
        grid=(n_tiles,),
        in_specs=[
            pl.BlockSpec((tm, d), lambda i: (i, 0)),      # x tile
            pl.BlockSpec((tm, d), lambda i: (i, 0)),      # y tile
            # Weights / fused bias: fetched once, single-buffered, VMEM-resident.
            pl.BlockSpec((d, nb_pad), lambda i: (0, 0),
                         pipeline_mode=pl.Buffered(1)),   # W1^T
            pl.BlockSpec((nb_pad, d), lambda i: (0, 0),
                         pipeline_mode=pl.Buffered(1)),   # W2^T
            pl.BlockSpec((1, d), lambda i: (0, 0),
                         pipeline_mode=pl.Buffered(1)),   # b_eff
        ],
        out_specs=pl.BlockSpec((tm, d), lambda i: (i, 0)),
        compiler_params=pltpu.CompilerParams(
            dimension_semantics=("parallel",),
            vmem_limit_bytes=vmem_limit,
        ),
    )(x_flat, y_flat, w1_t, w2_t, b_eff)

    return out_flat.reshape(x.shape)


def init_params(key, d, n_bottleneck):
    """Deterministic synthetic params, shapes matching nn.Linear(d, nb), nn.Linear(nb, d).

    PyTorch stores weight as (out, in); we keep the transposed (in, out) layout.
    """
    k1, k2, k3, k4 = jax.random.split(key, 4)
    bound1 = 1.0 / (d ** 0.5)
    bound2 = 1.0 / (n_bottleneck ** 0.5)
    w1_t = jax.random.uniform(k1, (d, n_bottleneck), jnp.float32, -bound1, bound1)
    b1 = jax.random.uniform(k2, (1, n_bottleneck), jnp.float32, -bound1, bound1)
    w2_t = jax.random.uniform(k3, (n_bottleneck, d), jnp.float32, -bound2, bound2)
    b2 = jax.random.uniform(k4, (1, d), jnp.float32, -bound2, bound2)
    return w1_t, b1, w2_t, b2


if __name__ == "__main__":
    key = jax.random.PRNGKey(0)
    kx, ky, kp = jax.random.split(key, 3)

    # Small shapes: batch=2, channels=4, spatial=16 -> d = 4*16*16 = 1024
    B, C, H, W = 2, 4, 16, 16
    d = C * H * W
    n_bottleneck = 32

    x = jax.random.normal(kx, (B, C, H, W), jnp.float32)
    y = jax.random.normal(ky, (B, C, H, W), jnp.float32)
    w1_t, b1, w2_t, b2 = init_params(kp, d, n_bottleneck)

    out = linear_ae_m_loc(x, y, w1_t, b1, w2_t, b2)
    out = jax.block_until_ready(out)

    # Pure-JAX reference check (original, unfused bias formulation).
    z = x.reshape(B, d) + y.reshape(B, d)
    ref = ((z @ w1_t + b1) @ w2_t + b2).reshape(B, C, H, W)
    assert out.shape == x.shape
    assert jnp.allclose(out, ref, atol=1e-3, rtol=1e-3), "mismatch vs reference"

    print("KERNEL_OK")
</pallas_src>

<mosaic_0001>
module attributes {stable_mosaic.version = 11 : i64} {
  func.func @_linear_ae_kernel(%arg0: i32, %arg1: memref<2x1024xf32, #tpu.memory_space<vmem>>, %arg2: memref<2x1024xf32, #tpu.memory_space<vmem>>, %arg3: memref<1024x128xf32, #tpu.memory_space<vmem>>, %arg4: memref<128x1024xf32, #tpu.memory_space<vmem>>, %arg5: memref<1x1024xf32, #tpu.memory_space<vmem>>, %arg6: memref<2x1024xf32, #tpu.memory_space<vmem>>) attributes {dimension_semantics = [#tpu.dimension_semantics<parallel>], iteration_bounds = array<i64: 1>, scalar_prefetch = 0 : i64, scratch_operands = 0 : i64, tpu.core_type = #tpu.core_type<tc>, window_params = [{transform_indices = @transform_0, window_bounds = array<i64: 2, 1024>}, {transform_indices = @transform_1, window_bounds = array<i64: 2, 1024>}, {pipeline_mode = #tpu.pipeline_mode<synchronous>, transform_indices = @transform_2, window_bounds = array<i64: 1024, 128>}, {pipeline_mode = #tpu.pipeline_mode<synchronous>, transform_indices = @transform_3, window_bounds = array<i64: 128, 1024>}, {pipeline_mode = #tpu.pipeline_mode<synchronous>, transform_indices = @transform_4, window_bounds = array<i64: 1, 1024>}, {transform_indices = @transform_5, window_bounds = array<i64: 2, 1024>}]} {
    %c0 = arith.constant 0 : index
    %c0_0 = arith.constant 0 : index
    %0 = vector.load %arg1[%c0, %c0_0] : memref<2x1024xf32, #tpu.memory_space<vmem>>, vector<2x1024xf32>
    %c0_1 = arith.constant 0 : index
    %c0_2 = arith.constant 0 : index
    %1 = vector.load %arg2[%c0_1, %c0_2] : memref<2x1024xf32, #tpu.memory_space<vmem>>, vector<2x1024xf32>
    %2 = arith.addf %0, %1 : vector<2x1024xf32>
    %c0_3 = arith.constant 0 : index
    %c0_4 = arith.constant 0 : index
    %3 = vector.load %arg3[%c0_3, %c0_4] : memref<1024x128xf32, #tpu.memory_space<vmem>>, vector<1024x128xf32>
    %cst = arith.constant dense<0.000000e+00> : vector<2x128xf32>
    %4 = tpu.matmul %2, %3, %cst {dimension_numbers = #tpu.dot_dimension_numbers<[1], [0], [0], [1], [0, 0, 1, 1], [], []>} : vector<2x1024xf32>, vector<1024x128xf32>, vector<2x128xf32> -> vector<2x128xf32>
    %c0_5 = arith.constant 0 : index
    %c0_6 = arith.constant 0 : index
    %5 = vector.load %arg4[%c0_5, %c0_6] : memref<128x1024xf32, #tpu.memory_space<vmem>>, vector<128x1024xf32>
    %cst_7 = arith.constant dense<0.000000e+00> : vector<2x1024xf32>
    %6 = tpu.matmul %4, %5, %cst_7 {dimension_numbers = #tpu.dot_dimension_numbers<[1], [0], [0], [1], [0, 0, 1, 1], [], []>} : vector<2x128xf32>, vector<128x1024xf32>, vector<2x1024xf32> -> vector<2x1024xf32>
    %c0_8 = arith.constant 0 : index
    %c0_9 = arith.constant 0 : index
    %7 = vector.load %arg5[%c0_8, %c0_9] : memref<1x1024xf32, #tpu.memory_space<vmem>>, vector<1x1024xf32>
    %8 = vector.broadcast %7 : vector<1x1024xf32> to vector<2x1024xf32>
    %9 = arith.addf %6, %8 : vector<2x1024xf32>
    %c0_10 = arith.constant 0 : index
    %c0_11 = arith.constant 0 : index
    %10 = vector.load %arg6[%c0_10, %c0_11] : memref<2x1024xf32, #tpu.memory_space<vmem>>, vector<2x1024xf32>
    tpu.vector_store %arg6[%c0_10, %c0_11], %9 {strides = array<i32>} : memref<2x1024xf32, #tpu.memory_space<vmem>>, vector<2x1024xf32>,
    return
  }
  func.func @transform_0(%arg0: i32) -> (i32, i32) {
    %c0_i32 = arith.constant 0 : i32
    %c0_i32_0 = arith.constant 0 : i32
    return %arg0, %c0_i32 : i32, i32
  }
  func.func @transform_1(%arg0: i32) -> (i32, i32) {
    %c0_i32 = arith.constant 0 : i32
    %c0_i32_0 = arith.constant 0 : i32
    return %arg0, %c0_i32 : i32, i32
  }
  func.func @transform_2(%arg0: i32) -> (i32, i32) {
    %c0_i32 = arith.constant 0 : i32
    %c0_i32_0 = arith.constant 0 : i32
    %c0_i32_1 = arith.constant 0 : i32
    return %c0_i32, %c0_i32_0 : i32, i32
  }
  func.func @transform_3(%arg0: i32) -> (i32, i32) {
    %c0_i32 = arith.constant 0 : i32
    %c0_i32_0 = arith.constant 0 : i32
    %c0_i32_1 = arith.constant 0 : i32
    return %c0_i32, %c0_i32_0 : i32, i32
  }
  func.func @transform_4(%arg0: i32) -> (i32, i32) {
    %c0_i32 = arith.constant 0 : i32
    %c0_i32_0 = arith.constant 0 : i32
    %c0_i32_1 = arith.constant 0 : i32
    return %c0_i32, %c0_i32_0 : i32, i32
  }
  func.func @transform_5(%arg0: i32) -> (i32, i32) {
    %c0_i32 = arith.constant 0 : i32
    %c0_i32_0 = arith.constant 0 : i32
    return %arg0, %c0_i32 : i32, i32
  }
}

</mosaic_0001>

<bundles_post_ra>
// kernel: tpu_custom_call.1
= control target key start
LH: loop header
LB: loop body
LE: loop exit
PB: predicated region body
PF: predicated region fallthrough
CT: control target
= control target key end

     0   :  { %10 = vsyncpa [#allocation3], 0  ;;  %s1703_s0 = inlined_call_operand.hbm [shape: f32[2,1024], index: 0, kind: input, shape index: {}]   ;;  %s1704_s1 = inlined_call_operand.hbm [shape: f32[2,1024], index: 1, kind: input, shape index: {}]   ;;  %s1705_s2 = inlined_call_operand.hbm [shape: f32[1024,128], index: 2, kind: input, shape index: {}]   ;;  %s1706_s3 = inlined_call_operand.hbm [shape: f32[128,1024], index: 3, kind: input, shape index: {}]   ;;  %s1707_s4 = inlined_call_operand.vmem [shape: f32[1,1024], index: 4, kind: input, shape index: {}]   ;;  %s1708_s5 = inlined_call_operand.hbm [shape: f32[2,1024], index: 5, kind: output, shape index: {}]  }
   0x1   :  { %11 = vsyncpa [#allocation6], 0 }
   0x2   :  { %12 = vsyncpa [#allocation9], 0 }
   0x3   :  { %13 = vsyncpa [#allocation4], 0  ;;  %s1572_s18 = smov [#allocation5]   ;;  %s1573_s20 = smov [#allocation2]  }
   0x4   :  { %s30_s19 = sshll.u32 %s1572_s18, 4  ;;  %s20_s21 = sshll.u32 %s1573_s20, 4  ;;  %s31_s19 = int_to_ptr.vmem [resolvable:$true] %s30_s19  ;;  %s21_s21 = int_to_ptr.vmem [resolvable:$true] %s20_s21 }
   0x5   :  { %s1454_s24 = scalar_lea.hbm %s1704_s1, 256 }
   0x6   :  { %p1455_p0 = scmp.ne.s32.totalorder %s1704_s1, %s1454_s24  ;;  %p1458_p1 = scmp.lt.u32.totalorder %s1454_s24, %s1704_s1 }
   0x8   :  { %p1460_p2 = pnand %p1458_p1, %p1455_p0 }
   0xa   :  { %1463 = shalt.err (!%p1460_p2)
}
   0xb   :  { %s1464_s29 = scalar_lea.vmem %s31_s19, 256  ;;  %p1469_p4 = scmp.lt.s32.totalorder %s31_s19, %s31_s19 }
   0xc   :  { %p1465_p3 = scmp.ne.s32.totalorder %s31_s19, %s1464_s29  ;;  %p1470_p5 = scmp.lt.s32.totalorder %s1464_s29, %s1464_s29 }
   0xe   :  { %p1471_p6 = por %p1470_p5, %p1469_p4 }
  0x10   :  { %p1472_p7 = pnand %p1471_p6, %p1465_p3 }
  0x12   :  { %1475 = shalt.err (!%p1472_p7)
}
  0x13   :  { %33 = dma.hbm_to_vmem [thread:$0]  %s1704_s1, 256, %s31_s19, [#allocation6]  }
  0x14   :  { %s1476_s9 = scalar_lea.hbm %s1703_s0, 256 }
  0x15   :  { %p1477_p8 = scmp.ne.s32.totalorder %s1703_s0, %s1476_s9  ;;  %p1480_p9 = scmp.lt.u32.totalorder %s1476_s9, %s1703_s0 }
  0x17   :  { %p1482_p10 = pnand %p1480_p9, %p1477_p8 }
  0x19   :  { %1485 = shalt.err (!%p1482_p10)
}
  0x1a   :  { %s1486_s14 = scalar_lea.vmem %s21_s21, 256  ;;  %p1491_p12 = scmp.lt.s32.totalorder %s21_s21, %s21_s21 }
  0x1b   :  { %p1487_p11 = scmp.ne.s32.totalorder %s21_s21, %s1486_s14  ;;  %p1492_p13 = scmp.lt.s32.totalorder %s1486_s14, %s1486_s14 }
  0x1d   :  { %p1493_p0 = por %p1492_p13, %p1491_p12 }
  0x1f   :  { %p1494_p1 = pnand %p1493_p0, %p1487_p11 }
  0x21   :  { %1497 = shalt.err (!%p1494_p1)
}
  0x22   :  { %23 = dma.hbm_to_vmem [thread:$0]  %s1703_s0, 256, %s21_s21, [#allocation3]  }
  0x23   :  { %s1574_s16 = smov [#allocation7]   ;;  %s1498_s20 = scalar_lea.hbm %s1705_s2, 16384 }
  0x24   :  { %s39_s17 = sshll.u32 %s1574_s16, 4  ;;  %p1499_p2 = scmp.ne.s32.totalorder %s1705_s2, %s1498_s20  ;;  %s40_s17 = int_to_ptr.vmem [resolvable:$true] %s39_s17 }
  0x25   :  { %p1502_p3 = scmp.lt.u32.totalorder %s1498_s20, %s1705_s2 }
  0x27   :  { %p1504_p4 = pnand %p1502_p3, %p1499_p2 }
  0x29   :  { %1507 = shalt.err (!%p1504_p4)
}
  0x2a   :  { %s1508_s26 = scalar_lea.vmem %s40_s17, 16384  ;;  %p1513_p6 = scmp.lt.s32.totalorder %s40_s17, %s40_s17 }
  0x2b   :  { %p1509_p5 = scmp.ne.s32.totalorder %s40_s17, %s1508_s26  ;;  %p1514_p7 = scmp.lt.s32.totalorder %s1508_s26, %s1508_s26 }
  0x2d   :  { %p1515_p8 = por %p1514_p7, %p1513_p6 }
  0x2f   :  { %p1516_p9 = pnand %p1515_p8, %p1509_p5 }
  0x31   :  { %1519 = shalt.err (!%p1516_p9)
}
  0x32   :  { %s1575_s0 = smov 128   ;;  %s1576_s21 = smov 8  }
  0x33   :  { %45 = dma.hbm_to_vmem [thread:$0]  %s1705_s2, 16384, %s40_s17, [#allocation6], %s1575_s0, %s1575_s0, %s1576_s21  }
  0x34   :  { %s1577_s29 = smov [#allocation8]   ;;  %s1520_s8 = scalar_lea.hbm %s1706_s3, 16384 }
  0x35   :  { %s51_s30 = sshll.u32 %s1577_s29, 4  ;;  %p1521_p10 = scmp.ne.s32.totalorder %s1706_s3, %s1520_s8  ;;  %s52_s30 = int_to_ptr.vmem [resolvable:$true] %s51_s30 }
  0x36   :  { %p1524_p11 = scmp.lt.u32.totalorder %s1520_s8, %s1706_s3 }
  0x38   :  { %p1526_p12 = pnand %p1524_p11, %p1521_p10 }
  0x3a   :  { %1529 = shalt.err (!%p1526_p12)
}
  0x3b   :  { %s1530_s13 = scalar_lea.vmem %s52_s30, 16384  ;;  %p1535_p0 = scmp.lt.s32.totalorder %s52_s30, %s52_s30 }
  0x3c   :  { %p1531_p13 = scmp.ne.s32.totalorder %s52_s30, %s1530_s13  ;;  %p1536_p1 = scmp.lt.s32.totalorder %s1530_s13, %s1530_s13 }
  0x3e   :  { %p1537_p2 = por %p1536_p1, %p1535_p0 }
  0x40   :  { %p1538_p3 = pnand %p1537_p2, %p1531_p13 }
  0x42   :  { %1541 = shalt.err (!%p1538_p3)
}
  0x43   :  { %s1578_s2 = smov 1024   ;;  %s1579_s14 = smov 64  }
  0x44   :  { %57 = dma.hbm_to_vmem [thread:$0]  %s1706_s3, 16384, %s52_s30, [#allocation9], %s1578_s2, %s1578_s2, %s1579_s14  }
  0x45   :  { %1564 = dma.done.wait [#allocation3], 256  }
  0x46   :  { %1565 = vsyncadd [#allocation3], 4294967040 }
  0x47   :  { %1566 = dma.done.wait [#allocation6], 16640  }
  0x48   :  { %1567 = vsyncadd [#allocation6], 4294950656 }
  0x49   :  { %1568 = dma.done.wait [#allocation9], 16384  }
  0x4a   :  { %1569 = vsyncadd [#allocation9], 4294950912  ;;  %v94_v0 = vld [vmem:[#allocation7 + $0x80] sm:$0xff]  ;;  %v95_v1 = vld [vmem:[#allocation7 + $0x88] sm:$0xff]  ;;  %v1580_v51 = vmov 1983009808   ;;  %v212_v53 = vlaneseq }
  0x4b   :  { %v126_v2 = vld [vmem:[#allocation7 + $0x180] sm:$0xff]  ;;  %v1187_v3 = vpack.c.bf16 %v95_v1, %v94_v0  ;;  %v127_v4 = vld [vmem:[#allocation7 + $0x188] sm:$0xff]  ;;  %v96_v11 = vld [vmem:[#allocation7 + $0x90] sm:$0xff]  ;;  %v210_v52 = vunpack.c.l.s4 %v1580_v51 }
  0x4c   :  { %v78_v5 = vld [vmem:[#allocation7] sm:$0xff]  ;;  %v79_v6 = vld [vmem:[#allocation7 + $0x8] sm:$0xff]  ;;  %v1219_v7 = vpack.c.bf16 %v127_v4, %v126_v2  ;;  %v97_v13 = vld [vmem:[#allocation7 + $0x98] sm:$0xff] }
  0x4d   :  { %v1189_v8 = vpack.c.bf16 %v79_v6, %v78_v5  ;;  %v110_v9 = vld [vmem:[#allocation7 + $0x100] sm:$0xff]  ;;  %v111_v10 = vld [vmem:[#allocation7 + $0x108] sm:$0xff]  ;;  %1188 = vmatprep.subr.bf16.mxu0 %v1187_v3  ;;  %v128_v14 = vld [vmem:[#allocation7 + $0x190] sm:$0xff]  ;;  %v1191_v16 = vpack.c.bf16 %v97_v13, %v96_v11  ;;  %v211_v2 = vunpack.c.0.s8 %v210_v52  ;;  %v1661_v3 = vshrl.u32 %v212_v53, 7 }
  0x4e   :  { %v1221_v12 = vpack.c.bf16 %v111_v10, %v110_v9  ;;  %v129_v15 = vld [vmem:[#allocation7 + $0x198] sm:$0xff]  ;;  %1220 = vmatprep.subr.bf16.mxu1 %v1219_v7  ;;  %v80_v18 = vld [vmem:[#allocation7 + $0x10] sm:$0xff]  ;;  %v98_v23 = vld [vmem:[#allocation7 + $0xa0] sm:$0xff] }
  0x4f   :  { %1190 = vmatpush3.bf16.msra.mxu0 %v1189_v8  ;;  %v1223_v17 = vpack.c.bf16 %v129_v15, %v128_v14  ;;  %v81_v19 = vld [vmem:[#allocation7 + $0x18] sm:$0xff]  ;;  %v112_v20 = vld [vmem:[#allocation7 + $0x110] sm:$0xff]  ;;  %v99_v24 = vld [vmem:[#allocation7 + $0xa8] sm:$0xff] }
  0x50   :  { %1222 = vmatpush3.bf16.msra.mxu1 %v1221_v12  ;;  %v1193_v21 = vpack.c.bf16 %v81_v19, %v80_v18  ;;  %v113_v22 = vld [vmem:[#allocation7 + $0x118] sm:$0xff]  ;;  %1192 = vmatprep.subr.bf16.mxu0 %v1191_v16  ;;  %v1195_v26 = vpack.c.bf16 %v99_v24, %v98_v23  ;;  %v130_v27 = vld [vmem:[#allocation7 + $0x1a0] sm:$0xff]  ;;  %v131_v28 = vld [vmem:[#allocation7 + $0x1a8] sm:$0xff]  ;;  %v1664_v18 = vsub.s32 %v211_v2, %v1661_v3 }
  0x51   :  { %1224 = vmatprep.subr.bf16.mxu1 %v1223_v17  ;;  %v1225_v25 = vpack.c.bf16 %v113_v22, %v112_v20  ;;  %v82_v29 = vld [vmem:[#allocation7 + $0x20] sm:$0xff]  ;;  %v1227_v30 = vpack.c.bf16 %v131_v28, %v130_v27  ;;  %v83_v31 = vld [vmem:[#allocation7 + $0x28] sm:$0xff]  ;;  %v100_v35 = vld [vmem:[#allocation7 + $0xb0] sm:$0xff] }
  0x52   :  { %v114_v32 = vld [vmem:[#allocation7 + $0x120] sm:$0xff]  ;;  %v115_v33 = vld [vmem:[#allocation7 + $0x128] sm:$0xff]  ;;  %v1197_v34 = vpack.c.bf16 %v83_v31, %v82_v29  ;;  %v101_v36 = vld [vmem:[#allocation7 + $0xb8] sm:$0xff] }
  0x53   :  { %1194 = vmatpush3.bf16.msra.mxu0 %v1193_v21  ;;  %v132_v37 = vld [vmem:[#allocation7 + $0x1b0] sm:$0xff]  ;;  %v1229_v38 = vpack.c.bf16 %v115_v33, %v114_v32  ;;  %v1199_v39 = vpack.c.bf16 %v101_v36, %v100_v35  ;;  %v133_v40 = vld [vmem:[#allocation7 + $0x1b8] sm:$0xff]  ;;  %v102_v46 = vld [vmem:[#allocation7 + $0xc0] sm:$0xff] }
  0x54   :  { %1226 = vmatpush3.bf16.msra.mxu1 %v1225_v25  ;;  %1196 = vmatprep.subr.bf16.mxu0 %v1195_v26  ;;  %v84_v41 = vld [vmem:[#allocation7 + $0x30] sm:$0xff]  ;;  %v85_v42 = vld [vmem:[#allocation7 + $0x38] sm:$0xff]  ;;  %v1231_v43 = vpack.c.bf16 %v133_v40, %v132_v37  ;;  %v103_v47 = vld [vmem:[#allocation7 + $0xc8] sm:$0xff] }
  0x55   :  { %1228 = vmatprep.subr.bf16.mxu1 %v1227_v30  ;;  %v116_v44 = vld [vmem:[#allocation7 + $0x130] sm:$0xff]  ;;  %v117_v45 = vld [vmem:[#allocation7 + $0x138] sm:$0xff]  ;;  %v134_v48 = vld [vmem:[#allocation7 + $0x1c0] sm:$0xff]  ;;  %v1201_v50 = vpack.c.bf16 %v85_v42, %v84_v41  ;;  %v1203_v55 = vpack.c.bf16 %v103_v47, %v102_v46 }
  0x56   :  { %v135_v49 = vld [vmem:[#allocation7 + $0x1c8] sm:$0xff]  ;;  %v1233_v54 = vpack.c.bf16 %v117_v45, %v116_v44  ;;  %v86_v56 = vld [vmem:[#allocation7 + $0x40] sm:$0xff]  ;;  %v104_v61 = vld [vmem:[#allocation7 + $0xd0] sm:$0xff] }
  0x57   :  { %1198 = vmatpush3.bf16.msra.mxu0 %v1197_v34  ;;  %v87_v57 = vld [vmem:[#allocation7 + $0x48] sm:$0xff]  ;;  %v118_v58 = vld [vmem:[#allocation7 + $0x140] sm:$0xff]  ;;  %v1235_v59 = vpack.c.bf16 %v135_v49, %v134_v48  ;;  %v105_v62 = vld [vmem:[#allocation7 + $0xd8] sm:$0xff] }
  0x58   :  { %1230 = vmatpush3.bf16.msra.mxu1 %v1229_v38  ;;  %1200 = vmatprep.subr.bf16.mxu0 %v1199_v39  ;;  %v119_v60 = vld [vmem:[#allocation7 + $0x148] sm:$0xff]  ;;  %v136_v63 = vld [vmem:[#allocation7 + $0x1d0] sm:$0xff]  ;;  %v137_v0 = vld [vmem:[#allocation7 + $0x1d8] sm:$0xff]  ;;  %v1205_v1 = vpack.c.bf16 %v87_v57, %v86_v56  ;;  %v1207_v5 = vpack.c.bf16 %v105_v62, %v104_v61 }
  0x59   :  { %1232 = vmatprep.subr.bf16.mxu1 %v1231_v43  ;;  %v1237_v4 = vpack.c.bf16 %v119_v60, %v118_v58  ;;  %v88_v6 = vld [vmem:[#allocation7 + $0x50] sm:$0xff]  ;;  %v89_v7 = vld [vmem:[#allocation7 + $0x58] sm:$0xff]  ;;  %v1239_v9 = vpack.c.bf16 %v137_v0, %v136_v63  ;;  %v106_v11 = vld [vmem:[#allocation7 + $0xe0] sm:$0xff] }
  0x5a   :  { %v120_v8 = vld [vmem:[#allocation7 + $0x150] sm:$0xff]  ;;  %v121_v10 = vld [vmem:[#allocation7 + $0x158] sm:$0xff]  ;;  %v107_v12 = vld [vmem:[#allocation7 + $0xe8] sm:$0xff]  ;;  %v1209_v15 = vpack.c.bf16 %v89_v7, %v88_v6 }
  0x5b   :  { %1202 = vmatpush3.bf16.msra.mxu0 %v1201_v50  ;;  %v138_v13 = vld [vmem:[#allocation7 + $0x1e0] sm:$0xff]  ;;  %v139_v14 = vld [vmem:[#allocation7 + $0x1e8] sm:$0xff]  ;;  %v1241_v19 = vpack.c.bf16 %v121_v10, %v120_v8  ;;  %v1211_v20 = vpack.c.bf16 %v107_v12, %v106_v11  ;;  %v74_v23 = vld [vmem:[#allocation5] sm:$0xff] }
  0x5c   :  { %1234 = vmatpush3.bf16.msra.mxu1 %v1233_v54  ;;  %1204 = vmatprep.subr.bf16.mxu0 %v1203_v55  ;;  %v90_v16 = vld [vmem:[#allocation7 + $0x60] sm:$0xff]  ;;  %v91_v17 = vld [vmem:[#allocation7 + $0x68] sm:$0xff]  ;;  %v1243_v24 = vpack.c.bf16 %v139_v14, %v138_v13  ;;  %v108_v26 = vld [vmem:[#allocation7 + $0xf0] sm:$0xff] }
  0x5d   :  { %1236 = vmatprep.subr.bf16.mxu1 %v1235_v59  ;;  %v122_v21 = vld [vmem:[#allocation7 + $0x160] sm:$0xff]  ;;  %v123_v25 = vld [vmem:[#allocation7 + $0x168] sm:$0xff]  ;;  %v109_v27 = vld [vmem:[#allocation7 + $0xf8] sm:$0xff]  ;;  %v1213_v31 = vpack.c.bf16 %v91_v17, %v90_v16 }
  0x5e   :  { %v72_v22 = vld [vmem:[#allocation2] sm:$0xff]  ;;  %v140_v29 = vld [vmem:[#allocation7 + $0x1f0] sm:$0xff]  ;;  %v141_v30 = vld [vmem:[#allocation7 + $0x1f8] sm:$0xff]  ;;  %v1245_v34 = vpack.c.bf16 %v123_v25, %v122_v21  ;;  %v1215_v35 = vpack.c.bf16 %v109_v27, %v108_v26 }
  0x5f   :  { %1206 = vmatpush3.bf16.msra.mxu0 %v1205_v1  ;;  %v76_v28 = vadd.f32 %v74_v23, %v72_v22  ;;  %v92_v36 = vld [vmem:[#allocation7 + $0x70] sm:$0xff]  ;;  %v93_v37 = vld [vmem:[#allocation7 + $0x78] sm:$0xff]  ;;  %v1247_v39 = vpack.c.bf16 %v141_v30, %v140_v29  ;;  %v158_v43 = vld [vmem:[#allocation7 + $0x280] sm:$0xff] }
  0x60   :  { %1238 = vmatpush3.bf16.msra.mxu1 %v1237_v4  ;;  %1208 = vmatprep.subr.bf16.mxu0 %v1207_v5  ;;  %v124_v38 = vld [vmem:[#allocation7 + $0x170] sm:$0xff]  ;;  %v125_v40 = vld [vmem:[#allocation7 + $0x178] sm:$0xff]  ;;  %v159_v44 = vld [vmem:[#allocation7 + $0x288] sm:$0xff]  ;;  %v1217_v47 = vpack.c.bf16 %v93_v37, %v92_v36 }
  0x61   :  { %1240 = vmatprep.subr.bf16.mxu1 %v1239_v9  ;;  %v215_v32 = vrot.slane %v76_v28, %v1664_v18  ;;  %v208_v33 = vcombine.high %v76_v28, %v76_v28  ;;  %v190_v45 = vld [vmem:[#allocation7 + $0x380] sm:$0xff]  ;;  %v191_v46 = vld [vmem:[#allocation7 + $0x388] sm:$0xff]  ;;  %v1249_v49 = vpack.c.bf16 %v125_v40, %v124_v38  ;;  %v1251_v50 = vpack.c.bf16 %v159_v44, %v158_v43  ;;  %v160_v56 = vld [vmem:[#allocation7 + $0x290] sm:$0xff] }
  0x62   :  { %v142_v51 = vld [vmem:[#allocation7 + $0x200] sm:$0xff]  ;;  %v143_v52 = vld [vmem:[#allocation7 + $0x208] sm:$0xff]  ;;  %v1283_v54 = vpack.c.bf16 %v191_v46, %v190_v45  ;;  %v161_v57 = vld [vmem:[#allocation7 + $0x298] sm:$0xff] }
  0x63   :  { %1210 = vmatpush3.bf16.msra.mxu0 %v1209_v15  ;;  %v223_v41 = vcombine.high %v215_v32, %v215_v32  ;;  %v222_v42 = vrot.slane %v208_v33, %v1664_v18  ;;  %v174_v53 = vld [vmem:[#allocation7 + $0x300] sm:$0xff]  ;;  %v175_v55 = vld [vmem:[#allocation7 + $0x308] sm:$0xff]  ;;  %v192_v58 = vld [vmem:[#allocation7 + $0x390] sm:$0xff]  ;;  %v1253_v60 = vpack.c.bf16 %v143_v52, %v142_v51  ;;  %v1255_v62 = vpack.c.bf16 %v161_v57, %v160_v56 }
  0x64   :  { %1242 = vmatpush3.bf16.msra.mxu1 %v1241_v19  ;;  %1212 = vmatprep.subr.bf16.mxu0 %v1211_v20  ;;  %v193_v59 = vld [vmem:[#allocation7 + $0x398] sm:$0xff]  ;;  %v1285_v61 = vpack.c.bf16 %v175_v55, %v174_v53  ;;  %v144_v63 = vld [vmem:[#allocation7 + $0x210] sm:$0xff]  ;;  %v162_v5 = vld [vmem:[#allocation7 + $0x2a0] sm:$0xff] }
  0x65   :  { %1244 = vmatprep.subr.bf16.mxu1 %v1243_v24  ;;  %314 = vmatprep.mubr.f32.mxu0 %v223_v41  ;;  %v224_v48 = vcombine.high %v222_v42, %v222_v42  ;;  %v145_v0 = vld [vmem:[#allocation7 + $0x218] sm:$0xff]  ;;  %v176_v1 = vld [vmem:[#allocation7 + $0x310] sm:$0xff]  ;;  %v1287_v2 = vpack.c.bf16 %v193_v59, %v192_v58  ;;  %v163_v6 = vld [vmem:[#allocation7 + $0x2a8] sm:$0xff] }
  0x66   :  { %v177_v4 = vld [vmem:[#allocation7 + $0x318] sm:$0xff]  ;;  %v194_v7 = vld [vmem:[#allocation7 + $0x3a0] sm:$0xff]  ;;  %v195_v8 = vld [vmem:[#allocation7 + $0x3a8] sm:$0xff]  ;;  %v1257_v9 = vpack.c.bf16 %v145_v0, %v144_v63  ;;  %v1259_v11 = vpack.c.bf16 %v163_v6, %v162_v5 }
  0x67   :  { %1214 = vmatpush3.bf16.msra.mxu0 %v1213_v31  ;;  %384 = vmatprep.mubr.f32.mxu1 %v224_v48  ;;  %v1289_v10 = vpack.c.bf16 %v177_v4, %v176_v1  ;;  %v146_v12 = vld [vmem:[#allocation7 + $0x220] sm:$0xff]  ;;  %v147_v13 = vld [vmem:[#allocation7 + $0x228] sm:$0xff]  ;;  %v1291_v15 = vpack.c.bf16 %v195_v8, %v194_v7  ;;  %v164_v17 = vld [vmem:[#allocation7 + $0x2b0] sm:$0xff] }
  0x68   :  { %1246 = vmatpush3.bf16.msra.mxu1 %v1245_v34  ;;  %1216 = vmatprep.subr.bf16.mxu0 %v1215_v35  ;;  %v178_v14 = vld [vmem:[#allocation7 + $0x320] sm:$0xff]  ;;  %v179_v16 = vld [vmem:[#allocation7 + $0x328] sm:$0xff]  ;;  %v165_v19 = vld [vmem:[#allocation7 + $0x2b8] sm:$0xff]  ;;  %v1261_v22 = vpack.c.bf16 %v147_v13, %v146_v12 }
  0x69   :  { %1248 = vmatprep.subr.bf16.mxu1 %v1247_v39  ;;  %v196_v20 = vld [vmem:[#allocation7 + $0x3b0] sm:$0xff]  ;;  %v197_v21 = vld [vmem:[#allocation7 + $0x3b8] sm:$0xff]  ;;  %v1293_v24 = vpack.c.bf16 %v179_v16, %v178_v14  ;;  %v1263_v25 = vpack.c.bf16 %v165_v19, %v164_v17  ;;  %v166_v30 = vld [vmem:[#allocation7 + $0x2c0] sm:$0xff] }
  0x6a   :  { %v148_v23 = vld [vmem:[#allocation7 + $0x230] sm:$0xff]  ;;  %v149_v26 = vld [vmem:[#allocation7 + $0x238] sm:$0xff]  ;;  %v1295_v29 = vpack.c.bf16 %v197_v21, %v196_v20  ;;  %v167_v31 = vld [vmem:[#allocation7 + $0x2c8] sm:$0xff] }
  0x6b   :  { %1218 = vmatpush3.bf16.msra.mxu0 %v1217_v47  ;;  %v180_v27 = vld [vmem:[#allocation7 + $0x330] sm:$0xff]  ;;  %v181_v28 = vld [vmem:[#allocation7 + $0x338] sm:$0xff]  ;;  %v199_v33 = vld [vmem:[#allocation7 + $0x3c8] sm:$0xff]  ;;  %v1265_v36 = vpack.c.bf16 %v149_v26, %v148_v23  ;;  %v1267_v39 = vpack.c.bf16 %v167_v31, %v166_v30 }
  0x6c   :  { %1250 = vmatpush3.bf16.msra.mxu1 %v1249_v49  ;;  %1252 = vmatprep.subr.bf16.mxu0 %v1251_v50  ;;  %v73_v34 = vld [vmem:[#allocation2 + $0x8] sm:$0xff]  ;;  %v75_v35 = vld [vmem:[#allocation5 + $0x8] sm:$0xff]  ;;  %v1297_v38 = vpack.c.bf16 %v181_v28, %v180_v27  ;;  %v150_v40 = vld [vmem:[#allocation7 + $0x240] sm:$0xff] }
  0x6d   :  { %1284 = vmatprep.subr.bf16.mxu1 %v1283_v54  ;;  %v77_v37 = vadd.f32 %v75_v35, %v73_v34  ;;  %v151_v41 = vld [vmem:[#allocation7 + $0x248] sm:$0xff]  ;;  %v168_v45 = vld [vmem:[#allocation7 + $0x2d0] sm:$0xff]  ;;  %v169_v46 = vld [vmem:[#allocation7 + $0x2d8] sm:$0xff] }
  0x6e   :  { %315 = vmatmul.mubr.f32.vlgmr.msra.gmra.mrb[0].mxu0 %v215_v32  ;;  %v198_v32 = vld [vmem:[#allocation7 + $0x3c0] sm:$0xff]  ;;  %v183_v44 = vld [vmem:[#allocation7 + $0x348] sm:$0xff]  ;;  %v200_v49 = vld [vmem:[#allocation7 + $0x3d0] sm:$0xff]  ;;  %v1269_v51 = vpack.c.bf16 %v151_v41, %v150_v40  ;;  %v1271_v55 = vpack.c.bf16 %v169_v46, %v168_v45 }
  0x6f   :  { %385 = vmatmul.mubr.f32.vlgmr.msra.gmra.mrb[0].mxu1 %v222_v42  ;;  %1254 = vmatpush3.bf16.msra.mxu0 %v1253_v60  ;;  %v182_v42 = vld [vmem:[#allocation7 + $0x340] sm:$0xff]  ;;  %v1299_v43 = vpack.c.bf16 %v199_v33, %v198_v32  ;;  %v232_v47 = vrot.slane %v77_v37, %v1664_v18  ;;  %v225_v48 = vcombine.high %v77_v37, %v77_v37  ;;  %v201_v50 = vld [vmem:[#allocation7 + $0x3d8] sm:$0xff]  ;;  %v152_v56 = vld [vmem:[#allocation7 + $0x250] sm:$0xff] }
  0x70   :  { %1286 = vmatpush3.bf16.msra.mxu1 %v1285_v61  ;;  %1256 = vmatprep.subr.bf16.mxu0 %v1255_v62  ;;  %v1301_v54 = vpack.c.bf16 %v183_v44, %v182_v42  ;;  %v153_v57 = vld [vmem:[#allocation7 + $0x258] sm:$0xff]  ;;  %v184_v58 = vld [vmem:[#allocation7 + $0x350] sm:$0xff]  ;;  %v1303_v59 = vpack.c.bf16 %v201_v50, %v200_v49  ;;  %v170_v61 = vld [vmem:[#allocation7 + $0x2e0] sm:$0xff] }
  0x71   :  { %1288 = vmatprep.subr.bf16.mxu1 %v1287_v2  ;;  %v240_v52 = vcombine.high %v232_v47, %v232_v47  ;;  %v239_v53 = vrot.slane %v225_v48, %v1664_v18  ;;  %v185_v60 = vld [vmem:[#allocation7 + $0x358] sm:$0xff]  ;;  %v171_v62 = vld [vmem:[#allocation7 + $0x2e8] sm:$0xff]  ;;  %v202_v0 = vld [vmem:[#allocation7 + $0x3e0] sm:$0xff]  ;;  %v1273_v2 = vpack.c.bf16 %v153_v57, %v152_v56 }
  0x72   :  { %v203_v1 = vld [vmem:[#allocation7 + $0x3e8] sm:$0xff]  ;;  %v1305_v4 = vpack.c.bf16 %v185_v60, %v184_v58  ;;  %v1275_v5 = vpack.c.bf16 %v171_v62, %v170_v61  ;;  %v154_v6 = vld [vmem:[#allocation7 + $0x260] sm:$0xff]  ;;  %v173_v12 = vld [vmem:[#allocation7 + $0x2f8] sm:$0xff] }
  0x73   :  { %1258 = vmatpush3.bf16.msra.mxu0 %v1257_v9  ;;  %454 = vmatprep.mubr.f32.mxu0 %v240_v52  ;;  %v241_v63 = vcombine.high %v239_v53, %v239_v53  ;;  %v155_v7 = vld [vmem:[#allocation7 + $0x268] sm:$0xff]  ;;  %v186_v8 = vld [vmem:[#allocation7 + $0x360] sm:$0xff]  ;;  %v1307_v9 = vpack.c.bf16 %v203_v1, %v202_v0  ;;  %v204_v13 = vld [vmem:[#allocation7 + $0x3f0] sm:$0xff] }
  0x74   :  { %1290 = vmatpush3.bf16.msra.mxu1 %v1289_v10  ;;  %1260 = vmatprep.subr.bf16.mxu0 %v1259_v11  ;;  %v187_v10 = vld [vmem:[#allocation7 + $0x368] sm:$0xff]  ;;  %v172_v11 = vld [vmem:[#allocation7 + $0x2f0] sm:$0xff]  ;;  %v205_v14 = vld [vmem:[#allocation7 + $0x3f8] sm:$0xff] }
  0x75   :  { %1292 = vmatprep.subr.bf16.mxu1 %v1291_v15  ;;  %524 = vmatprep.mubr.f32.mxu1 %v241_v63  ;;  %v1277_v15 = vpack.c.bf16 %v155_v7, %v154_v6  ;;  %v1309_v16 = vpack.c.bf16 %v187_v10, %v186_v8  ;;  %v1279_v17 = vpack.c.bf16 %v173_v12, %v172_v11  ;;  %v156_v19 = vld [vmem:[#allocation7 + $0x270] sm:$0xff]  ;;  %v157_v20 = vld [vmem:[#allocation7 + $0x278] sm:$0xff]  ;;  %v531_v26 = vld [vmem:[#allocation8 + $0x8] sm:$0xff] }
  0x76   :  { %v1311_v21 = vpack.c.bf16 %v205_v14, %v204_v13  ;;  %v189_v23 = vld [vmem:[#allocation7 + $0x378] sm:$0xff]  ;;  %v539_v27 = vld [vmem:[#allocation8 + $0x48] sm:$0xff]  ;;  %v530_v31 = vld [vmem:[#allocation8] sm:$0xff] }
  0x77   :  { %1262 = vmatpush3.bf16.msra.mxu0 %v1261_v22  ;;  %v188_v22 = vld [vmem:[#allocation7 + $0x370] sm:$0xff]  ;;  %v533_v28 = vld [vmem:[#allocation8 + $0x18] sm:$0xff]  ;;  %v538_v32 = vld [vmem:[#allocation8 + $0x40] sm:$0xff] }
  0x78   :  { %1294 = vmatpush3.bf16.msra.mxu1 %v1293_v24  ;;  %1264 = vmatprep.subr.bf16.mxu0 %v1263_v25  ;;  %v1281_v24 = vpack.c.bf16 %v157_v20, %v156_v19  ;;  %v1313_v25 = vpack.c.bf16 %v189_v23, %v188_v22  ;;  %v541_v30 = vld [vmem:[#allocation8 + $0x58] sm:$0xff]  ;;  %v1317_v34 = vpack.c.bf16 %v538_v32, %v530_v31  ;;  %v532_v35 = vld [vmem:[#allocation8 + $0x10] sm:$0xff]  ;;  %v547_v37 = vld [vmem:[#allocation8 + $0x88] sm:$0xff] }
  0x79   :  { %1296 = vmatprep.subr.bf16.mxu1 %v1295_v29  ;;  %v1315_v29 = vpack.c.bf16 %v539_v27, %v531_v26  ;;  %v1347_v33 = vpack.c.bf16 %v541_v30, %v533_v28  ;;  %v549_v40 = vld [vmem:[#allocation8 + $0x98] sm:$0xff]  ;;  %v546_v44 = vld [vmem:[#allocation8 + $0x80] sm:$0xff]  ;;  %v548_v46 = vld [vmem:[#allocation8 + $0x90] sm:$0xff] }
  0x7a   :  { %v557_v41 = vld [vmem:[#allocation8 + $0xd8] sm:$0xff]  ;;  %v554_v45 = vld [vmem:[#allocation8 + $0xc0] sm:$0xff]  ;;  %v556_v48 = vld [vmem:[#allocation8 + $0xd0] sm:$0xff] }
  0x7b   :  { %1266 = vmatpush3.bf16.msra.mxu0 %v1265_v36  ;;  %v540_v36 = vld [vmem:[#allocation8 + $0x50] sm:$0xff]  ;;  %v563_v49 = vld [vmem:[#allocation8 + $0x108] sm:$0xff]  ;;  %v570_v57 = vld [vmem:[#allocation8 + $0x140] sm:$0xff] }
  0x7c   :  { %1298 = vmatpush3.bf16.msra.mxu1 %v1297_v38  ;;  %1268 = vmatprep.subr.bf16.mxu0 %v1267_v39  ;;  %v1349_v38 = vpack.c.bf16 %v540_v36, %v532_v35  ;;  %v555_v39 = vld [vmem:[#allocation8 + $0xc8] sm:$0xff]  ;;  %v564_v58 = vld [vmem:[#allocation8 + $0x110] sm:$0xff]  ;;  %v581_v63 = vld [vmem:[#allocation8 + $0x198] sm:$0xff] }
  0x7d   :  { %1300 = vmatprep.subr.bf16.mxu1 %v1299_v43  ;;  %v1319_v42 = vpack.c.bf16 %v555_v39, %v547_v37  ;;  %v1351_v43 = vpack.c.bf16 %v557_v41, %v549_v40  ;;  %v571_v50 = vld [vmem:[#allocation8 + $0x148] sm:$0xff]  ;;  %v580_v7 = vld [vmem:[#allocation8 + $0x190] sm:$0xff]  ;;  %v597_v11 = vld [vmem:[#allocation8 + $0x218] sm:$0xff] }
  0x7e   :  { %v1323_v52 = vpack.c.bf16 %v571_v50, %v563_v49  ;;  %v579_v61 = vld [vmem:[#allocation8 + $0x188] sm:$0xff]  ;;  %v588_v8 = vld [vmem:[#allocation8 + $0x1d0] sm:$0xff]  ;;  %v605_v12 = vld [vmem:[#allocation8 + $0x258] sm:$0xff] }
  0x7f   :  { %1270 = vmatpush3.bf16.msra.mxu0 %v1269_v51  ;;  %v1353_v51 = vpack.c.bf16 %v556_v48, %v548_v46  ;;  %v587_v62 = vld [vmem:[#allocation8 + $0x1c8] sm:$0xff]  ;;  %v1361_v14 = vpack.c.bf16 %v588_v8, %v580_v7  ;;  %v596_v19 = vld [vmem:[#allocation8 + $0x210] sm:$0xff]  ;;  %v1363_v20 = vpack.c.bf16 %v605_v12, %v597_v11  ;;  %v618_v30 = vld [vmem:[#allocation8 + $0x2c0] sm:$0xff] }
  0x80   :  { %1302 = vmatpush3.bf16.msra.mxu1 %v1301_v54  ;;  %1272 = vmatprep.subr.bf16.mxu0 %v1271_v55  ;;  %v573_v54 = vld [vmem:[#allocation8 + $0x158] sm:$0xff]  ;;  %v562_v55 = vld [vmem:[#allocation8 + $0x100] sm:$0xff]  ;;  %v1327_v1 = vpack.c.bf16 %v587_v62, %v579_v61  ;;  %v603_v10 = vld [vmem:[#allocation8 + $0x248] sm:$0xff] }
  0x81   :  { %1304 = vmatprep.subr.bf16.mxu1 %v1303_v59  ;;  %v572_v59 = vld [vmem:[#allocation8 + $0x150] sm:$0xff]  ;;  %v1325_v60 = vpack.c.bf16 %v570_v57, %v562_v55  ;;  %v611_v22 = vld [vmem:[#allocation8 + $0x288] sm:$0xff]  ;;  %v629_v36 = vld [vmem:[#allocation8 + $0x318] sm:$0xff] }
  0x82   :  { %v1357_v0 = vpack.c.bf16 %v572_v59, %v564_v58  ;;  %v619_v23 = vld [vmem:[#allocation8 + $0x2c8] sm:$0xff]  ;;  %v612_v31 = vld [vmem:[#allocation8 + $0x290] sm:$0xff]  ;;  %v637_v37 = vld [vmem:[#allocation8 + $0x358] sm:$0xff] }
  0x83   :  { %1274 = vmatpush3.bf16.msra.mxu0 %v1273_v2  ;;  %v589_v2 = vld [vmem:[#allocation8 + $0x1d8] sm:$0xff]  ;;  %v1335_v28 = vpack.c.bf16 %v619_v23, %v611_v22  ;;  %v635_v35 = vld [vmem:[#allocation8 + $0x348] sm:$0xff]  ;;  %v1371_v41 = vpack.c.bf16 %v637_v37, %v629_v36  ;;  %v636_v46 = vld [vmem:[#allocation8 + $0x350] sm:$0xff] }
  0x84   :  { %1306 = vmatpush3.bf16.msra.mxu1 %v1305_v4  ;;  %1276 = vmatprep.subr.bf16.mxu0 %v1275_v5  ;;  %v578_v4 = vld [vmem:[#allocation8 + $0x180] sm:$0xff]  ;;  %v1359_v6 = vpack.c.bf16 %v589_v2, %v581_v63  ;;  %v643_v48 = vld [vmem:[#allocation8 + $0x388] sm:$0xff]  ;;  %v645_v50 = vld [vmem:[#allocation8 + $0x398] sm:$0xff] }
  0x85   :  { %1308 = vmatprep.subr.bf16.mxu1 %v1307_v9  ;;  %v586_v5 = vld [vmem:[#allocation8 + $0x1c0] sm:$0xff]  ;;  %v595_v9 = vld [vmem:[#allocation8 + $0x208] sm:$0xff]  ;;  %v644_v57 = vld [vmem:[#allocation8 + $0x390] sm:$0xff] }
  0x86   :  { %v1329_v13 = vpack.c.bf16 %v586_v5, %v578_v4  ;;  %v651_v49 = vld [vmem:[#allocation8 + $0x3c8] sm:$0xff]  ;;  %v652_v58 = vld [vmem:[#allocation8 + $0x3d0] sm:$0xff]  ;;  %v537_v62 = vld [vmem:[#allocation8 + $0x38] sm:$0xff] }
  0x87   :  { %1278 = vmatpush3.bf16.msra.mxu0 %v1277_v15  ;;  %v1331_v15 = vpack.c.bf16 %v603_v10, %v595_v9  ;;  %v1377_v59 = vpack.c.bf16 %v652_v58, %v644_v57  ;;  %v543_v61 = vld [vmem:[#allocation8 + $0x68] sm:$0xff]  ;;  %v584_v58 = vld [vmem:[#allocation8 + $0x1b0] sm:$0xff] }
  0x88   :  { %1310 = vmatpush3.bf16.msra.mxu1 %v1309_v16  ;;  %1280 = vmatprep.subr.bf16.mxu0 %v1279_v17  ;;  %v594_v16 = vld [vmem:[#allocation8 + $0x200] sm:$0xff]  ;;  %v559_v23 = vld [vmem:[#allocation8 + $0xe8] sm:$0xff] }
  0x89   :  { %1312 = vmatprep.subr.bf16.mxu1 %v1311_v21  ;;  %v602_v17 = vld [vmem:[#allocation8 + $0x240] sm:$0xff]  ;;  %v604_v21 = vld [vmem:[#allocation8 + $0x250] sm:$0xff]  ;;  %v567_v36 = vld [vmem:[#allocation8 + $0x128] sm:$0xff] }
  0x8a   :  { %v1333_v26 = vpack.c.bf16 %v602_v17, %v594_v16  ;;  %v1365_v27 = vpack.c.bf16 %v604_v21, %v596_v19  ;;  %v536_v19 = vld [vmem:[#allocation8 + $0x30] sm:$0xff]  ;;  %v551_v21 = vld [vmem:[#allocation8 + $0xa8] sm:$0xff] }
  0x8b   :  { %1282 = vmatpush3.bf16.msra.mxu0 %v1281_v24  ;;  %v613_v24 = vld [vmem:[#allocation8 + $0x298] sm:$0xff]  ;;  %v575_v37 = vld [vmem:[#allocation8 + $0x168] sm:$0xff] }
  0x8c   :  { %1314 = vmatpush3.bf16.msra.mxu1 %v1313_v25  ;;  %1316 = vmatprep.subr.bf16.mxu0 %v1315_v29  ;;  %v621_v25 = vld [vmem:[#allocation8 + $0x2d8] sm:$0xff]  ;;  %v610_v29 = vld [vmem:[#allocation8 + $0x280] sm:$0xff] }
  0x8d   :  { %1348 = vmatprep.subr.bf16.mxu1 %v1347_v33  ;;  %v1367_v32 = vpack.c.bf16 %v621_v25, %v613_v24  ;;  %v620_v33 = vld [vmem:[#allocation8 + $0x2d0] sm:$0xff]  ;;  %v553_v24 = vld [vmem:[#allocation8 + $0xb8] sm:$0xff] }
  0x8e   :  { %455 = vmatmul.mubr.f32.vlgmr.msra.gmra.mrb[2].mxu0 %v232_v47  ;;  %v1321_v47 = vpack.c.bf16 %v554_v45, %v546_v44  ;;  %v1369_v39 = vpack.c.bf16 %v620_v33, %v612_v31  ;;  %v628_v44 = vld [vmem:[#allocation8 + $0x310] sm:$0xff]  ;;  %v561_v25 = vld [vmem:[#allocation8 + $0xf8] sm:$0xff] }
  0x8f   :  { %525 = vmatmul.mubr.f32.vlgmr.msra.gmra.mrb[2].mxu1 %v239_v53  ;;  %1318 = vmatpush1.bf16.msra.mxu0 %v1317_v34  ;;  %v565_v53 = vld [vmem:[#allocation8 + $0x118] sm:$0xff]  ;;  %v627_v34 = vld [vmem:[#allocation8 + $0x308] sm:$0xff]  ;;  %v1415_v33 = vpack.c.bf16 %v561_v25, %v553_v24 }
  0x90   :  { %1350 = vmatpush1.bf16.msra.mxu1 %v1349_v38  ;;  %1320 = vmatprep.subr.bf16.mxu0 %v1319_v42  ;;  %v1355_v56 = vpack.c.bf16 %v573_v54, %v565_v53  ;;  %v1337_v38 = vpack.c.bf16 %v618_v30, %v610_v29  ;;  %v1339_v40 = vpack.c.bf16 %v635_v35, %v627_v34  ;;  %v626_v42 = vld [vmem:[#allocation8 + $0x300] sm:$0xff]  ;;  %v552_v34 = vld [vmem:[#allocation8 + $0xb0] sm:$0xff]  ;;  %v633_v24 = vld [vmem:[#allocation8 + $0x338] sm:$0xff] }
  0x91   :  { %1352 = vmatprep.subr.bf16.mxu1 %v1351_v43  ;;  %v634_v43 = vld [vmem:[#allocation8 + $0x340] sm:$0xff]  ;;  %v560_v35 = vld [vmem:[#allocation8 + $0xf0] sm:$0xff]  ;;  %v641_v25 = vld [vmem:[#allocation8 + $0x378] sm:$0xff] }
  0x92   :  { %v1341_v45 = vpack.c.bf16 %v634_v43, %v626_v42  ;;  %v642_v53 = vld [vmem:[#allocation8 + $0x380] sm:$0xff] }
  0x93   :  { %1322 = vmatpush1.bf16.msra.mxu0 %v1321_v47  ;;  %v1373_v47 = vpack.c.bf16 %v636_v46, %v628_v44  ;;  %v650_v54 = vld [vmem:[#allocation8 + $0x3c0] sm:$0xff]  ;;  %v1387_v44 = vpack.c.bf16 %v575_v37, %v567_v36  ;;  %v568_v46 = vld [vmem:[#allocation8 + $0x130] sm:$0xff]  ;;  %v655_v36 = vld [vmem:[#allocation8 + $0x3e8] sm:$0xff] }
  0x94   :  { %1354 = vmatpush1.bf16.msra.mxu1 %v1353_v51  ;;  %1324 = vmatprep.subr.bf16.mxu0 %v1323_v52  ;;  %v1343_v51 = vpack.c.bf16 %v651_v49, %v643_v48  ;;  %v653_v52 = vld [vmem:[#allocation8 + $0x3d8] sm:$0xff]  ;;  %v550_v29 = vld [vmem:[#allocation8 + $0xa0] sm:$0xff]  ;;  %v583_v48 = vld [vmem:[#allocation8 + $0x1a8] sm:$0xff] }
  0x95   :  { %1356 = vmatprep.subr.bf16.mxu1 %v1355_v56  ;;  %v1375_v55 = vpack.c.bf16 %v653_v52, %v645_v50  ;;  %v1345_v56 = vpack.c.bf16 %v650_v54, %v642_v53  ;;  %v558_v30 = vld [vmem:[#allocation8 + $0xe0] sm:$0xff]  ;;  %v591_v49 = vld [vmem:[#allocation8 + $0x1e8] sm:$0xff]  ;;  %v585_v50 = vld [vmem:[#allocation8 + $0x1b8] sm:$0xff] }
  0x96   :  { %v566_v42 = vld [vmem:[#allocation8 + $0x120] sm:$0xff]  ;;  %v649_v37 = vld [vmem:[#allocation8 + $0x3b8] sm:$0xff] }
  0x97   :  { %1326 = vmatpush1.bf16.msra.mxu0 %v1325_v60  ;;  %v535_v60 = vld [vmem:[#allocation8 + $0x28] sm:$0xff]  ;;  %v574_v43 = vld [vmem:[#allocation8 + $0x160] sm:$0xff] }
  0x98   :  { %1358 = vmatpush1.bf16.msra.mxu1 %v1357_v0  ;;  %1328 = vmatprep.subr.bf16.mxu0 %v1327_v1  ;;  %v1379_v63 = vpack.c.bf16 %v543_v61, %v535_v60  ;;  %v545_v0 = vld [vmem:[#allocation8 + $0x78] sm:$0xff]  ;;  %v1581_v1 = vmov 0.0   ;;  %v1389_v52 = vpack.c.bf16 %v574_v43, %v566_v42  ;;  %v582_v54 = vld [vmem:[#allocation8 + $0x1a0] sm:$0xff]  ;;  %v599_v60 = vld [vmem:[#allocation8 + $0x228] sm:$0xff] }
  0x99   :  { %1360 = vmatprep.subr.bf16.mxu1 %v1359_v6  ;;  %764 = vmatprep.mubr.f32.mxu0 %v1581_v1  ;;  %v1411_v2 = vpack.c.bf16 %v545_v0, %v537_v62  ;;  %v607_v61 = vld [vmem:[#allocation8 + $0x268] sm:$0xff]  ;;  %v601_v62 = vld [vmem:[#allocation8 + $0x238] sm:$0xff] }
  0x9a   :  { %835 = vmatprep.mubr.f32.mxu1 %v1581_v1 }
  0x9b   :  { %1330 = vmatpush1.bf16.msra.mxu0 %v1329_v13 }
  0x9c   :  { %1362 = vmatpush1.bf16.msra.mxu1 %v1361_v14  ;;  %1332 = vmatprep.subr.bf16.mxu0 %v1331_v15  ;;  %v534_v14 = vld [vmem:[#allocation8 + $0x20] sm:$0xff] }
  0x9d   :  { %1364 = vmatprep.subr.bf16.mxu1 %v1363_v20  ;;  %v542_v15 = vld [vmem:[#allocation8 + $0x60] sm:$0xff]  ;;  %v544_v20 = vld [vmem:[#allocation8 + $0x70] sm:$0xff] }
  0x9f   :  { %1334 = vmatpush1.bf16.msra.mxu0 %v1333_v26 }
  0xa0   :  { %1366 = vmatpush1.bf16.msra.mxu1 %v1365_v27  ;;  %1336 = vmatprep.subr.bf16.mxu0 %v1335_v28  ;;  %v1381_v27 = vpack.c.bf16 %v542_v15, %v534_v14  ;;  %v1413_v28 = vpack.c.bf16 %v544_v20, %v536_v19  ;;  %v614_v15 = vld [vmem:[#allocation8 + $0x2a0] sm:$0xff]  ;;  %v616_v20 = vld [vmem:[#allocation8 + $0x2b0] sm:$0xff] }
  0xa1   :  { %1368 = vmatprep.subr.bf16.mxu1 %v1367_v32  ;;  %v1383_v32 = vpack.c.bf16 %v559_v23, %v551_v21  ;;  %v624_v21 = vld [vmem:[#allocation8 + $0x2f0] sm:$0xff]  ;;  %v639_v23 = vld [vmem:[#allocation8 + $0x368] sm:$0xff] }
  0xa3   :  { %1338 = vmatpush1.bf16.msra.mxu0 %v1337_v38  ;;  %v569_v38 = vld [vmem:[#allocation8 + $0x138] sm:$0xff] }
  0xa4   :  { %1370 = vmatpush1.bf16.msra.mxu1 %v1369_v39  ;;  %1340 = vmatprep.subr.bf16.mxu0 %v1339_v40  ;;  %v577_v39 = vld [vmem:[#allocation8 + $0x178] sm:$0xff]  ;;  %v1385_v40 = vpack.c.bf16 %v558_v30, %v550_v29  ;;  %v638_v29 = vld [vmem:[#allocation8 + $0x360] sm:$0xff] }
  0xa5   :  { %1372 = vmatprep.subr.bf16.mxu1 %v1371_v41  ;;  %v1417_v41 = vpack.c.bf16 %v560_v35, %v552_v34  ;;  %v640_v34 = vld [vmem:[#allocation8 + $0x370] sm:$0xff]  ;;  %v647_v35 = vld [vmem:[#allocation8 + $0x3a8] sm:$0xff] }
  0xa6   :  { %v1407_v42 = vpack.c.bf16 %v655_v36, %v647_v35 }
  0xa7   :  { %1342 = vmatpush1.bf16.msra.mxu0 %v1341_v45  ;;  %v1419_v45 = vpack.c.bf16 %v577_v39, %v569_v38  ;;  %v657_v38 = vld [vmem:[#allocation8 + $0x3f8] sm:$0xff] }
  0xa8   :  { %1374 = vmatpush1.bf16.msra.mxu1 %v1373_v47  ;;  %1344 = vmatprep.subr.bf16.mxu0 %v1343_v51  ;;  %v576_v47 = vld [vmem:[#allocation8 + $0x170] sm:$0xff]  ;;  %v593_v51 = vld [vmem:[#allocation8 + $0x1f8] sm:$0xff]  ;;  %v1439_v43 = vpack.c.bf16 %v657_v38, %v649_v37 }
  0xa9   :  { %1376 = vmatprep.subr.bf16.mxu1 %v1375_v55  ;;  %v1421_v53 = vpack.c.bf16 %v576_v47, %v568_v46  ;;  %v590_v55 = vld [vmem:[#allocation8 + $0x1e0] sm:$0xff]  ;;  %v1423_v57 = vpack.c.bf16 %v593_v51, %v585_v50  ;;  %v656_v46 = vld [vmem:[#allocation8 + $0x3f0] sm:$0xff]  ;;  %v670_v50 = vsub.s32 2, %v1661_v3 }
  0xaa   :  { %v1393_v0 = vpack.c.bf16 %v590_v55, %v582_v54  ;;  %v658_v51 = vld [vmem:[%s1707_s4] sm:$0xff]  ;;  %s1582_s4 = smov [#allocation10]  }
  0xab   :  { %1346 = vmatpush1.bf16.msra.mxu0 %v1345_v56  ;;  %v1391_v56 = vpack.c.bf16 %v591_v49, %v583_v48  ;;  %v662_v49 = vsub.s32 0, %v1661_v3  ;;  %v671_v55 = vrot.slane %v658_v51, %v670_v50  ;;  %s1036_s17 = sshll.u32 %s1582_s4, 4  ;;  %s1037_s17 = int_to_ptr.vmem [resolvable:$true] %s1036_s17 }
  0xac   :  { %1378 = vmatpush1.bf16.msra.mxu1 %v1377_v59  ;;  %1380 = vmatprep.subr.bf16.mxu0 %v1379_v63  ;;  %v592_v59 = vld [vmem:[#allocation8 + $0x1f0] sm:$0xff]  ;;  %v609_v63 = vld [vmem:[#allocation8 + $0x278] sm:$0xff]  ;;  %s1542_s18 = scalar_lea.vmem %s1037_s17, 256  ;;  %p1547_p5 = scmp.lt.s32.totalorder %s1037_s17, %s1037_s17 }
  0xad   :  { %1412 = vmatprep.subr.bf16.mxu1 %v1411_v2  ;;  %v598_v2 = vld [vmem:[#allocation8 + $0x220] sm:$0xff]  ;;  %v663_v54 = vrot.slane %v658_v51, %v662_v49  ;;  %p1543_p4 = scmp.ne.s32.totalorder %s1037_s17, %s1542_s18  ;;  %p1548_p6 = scmp.lt.s32.totalorder %s1542_s18, %s1542_s18 }
  0xaf   :  { %p1549_p7 = por %p1548_p6, %p1547_p5 }
  0xb1   :  { %p1550_p8 = pnand %p1549_p7, %p1543_p4 }
 0x141   :  { %v1079_v4 = vpop.f32.mrb[0].mxu0 }
 0x142   :  { %v1114_v5 = vpop.f32.mrb[0].mxu1  ;;  %v1080_v6 = vpop.f32.mrb[1].mxu0 }
 0x143   :  { %v1081_v7 = vadd.f32 %v1080_v6, %v1079_v4  ;;  %v1115_v8 = vpop.f32.mrb[1].mxu1  ;;  %v606_v4 = vld [vmem:[#allocation8 + $0x260] sm:$0xff]  ;;  %v1427_v6 = vpack.c.bf16 %v609_v63, %v601_v62 }
 0x144   :  { %v1116_v9 = vadd.f32 %v1115_v8, %v1114_v5  ;;  %v1395_v5 = vpack.c.bf16 %v607_v61, %v599_v60  ;;  %v608_v8 = vld [vmem:[#allocation8 + $0x270] sm:$0xff] }
 0x146   :  { %v387_v10 = vadd.f32 %v1116_v9, %v1081_v7  ;;  %v600_v7 = vld [vmem:[#allocation8 + $0x230] sm:$0xff]  ;;  %v615_v9 = vld [vmem:[#allocation8 + $0x2a8] sm:$0xff] }
 0x147   :  { %v1429_v14 = vpack.c.bf16 %v608_v8, %v600_v7  ;;  %v678_v7 = vsub.s32 4, %v1661_v3  ;;  %v686_v8 = vsub.s32 6, %v1661_v3 }
 0x161   :  { %v1149_v11 = vpop.f32.mrb[2].mxu0 }
 0x162   :  { %v1150_v12 = vpop.f32.mrb[3].mxu0  ;;  %v1184_v13 = vpop.f32.mrb[2].mxu1 }
 0x163   :  { %v1151_v16 = vadd.f32 %v1150_v12, %v1149_v11  ;;  %v1185_v17 = vpop.f32.mrb[3].mxu1  ;;  %v617_v11 = vld [vmem:[#allocation8 + $0x2b8] sm:$0xff] }
 0x164   :  { %v1186_v22 = vadd.f32 %v1185_v17, %v1184_v13  ;;  %v625_v12 = vld [vmem:[#allocation8 + $0x2f8] sm:$0xff]  ;;  %v1397_v13 = vpack.c.bf16 %v606_v4, %v598_v2 }
 0x165   :  { %v457_v26 = vadd.f32 %v1151_v16, %v387_v10  ;;  %v623_v10 = vld [vmem:[#allocation8 + $0x2e8] sm:$0xff]  ;;  %v622_v16 = vld [vmem:[#allocation8 + $0x2e0] sm:$0xff]  ;;  %v1431_v19 = vpack.c.bf16 %v625_v12, %v617_v11  ;;  %v679_v11 = vrot.slane %v658_v51, %v678_v7  ;;  %v687_v12 = vrot.slane %v658_v51, %v686_v8 }
 0x166   :  { %v1399_v17 = vpack.c.bf16 %v623_v10, %v615_v9  ;;  %v682_v9 = vsub.s32 5, %v1661_v3  ;;  %v690_v10 = vsub.s32 7, %v1661_v3 }
 0x167   :  { %v1670_v31 = vadd.f32 %v1186_v22, %v457_v26  ;;  %v631_v22 = vld [vmem:[#allocation8 + $0x328] sm:$0xff]  ;;  %v1401_v26 = vpack.c.bf16 %v622_v16, %v614_v15 }
 0x168   :  { %v1403_v30 = vpack.c.bf16 %v639_v23, %v631_v22 }
 0x169   :  { %765 = vmatmul.mubr.f32.vlgmr.msra.gmra.mrb[4].mxu0 %v1670_v31  ;;  %836 = vmatmul.mubr.f32.vlgmr.msra.gmra.mrb[4].mxu1 %v1670_v31 }
 0x16a   :  { %1382 = vmatpush1.bf16.msra.mxu0 %v1381_v27  ;;  %1414 = vmatpush1.bf16.msra.mxu1 %v1413_v28  ;;  %v1433_v27 = vpack.c.bf16 %v624_v21, %v616_v20  ;;  %v630_v28 = vld [vmem:[#allocation8 + $0x320] sm:$0xff] }
 0x16b   :  { %1384 = vmatprep.subr.bf16.mxu0 %v1383_v32  ;;  %1416 = vmatprep.subr.bf16.mxu1 %v1415_v33  ;;  %v1435_v32 = vpack.c.bf16 %v641_v25, %v633_v24  ;;  %v632_v33 = vld [vmem:[#allocation8 + $0x330] sm:$0xff]  ;;  %v1405_v39 = vpack.c.bf16 %v638_v29, %v630_v28 }
 0x16c   :  { %906 = vmatprep.mubr.f32.mxu0 %v1581_v1  ;;  %977 = vmatprep.mubr.f32.mxu1 %v1581_v1  ;;  %v1425_v1 = vpack.c.bf16 %v592_v59, %v584_v58 }
 0x16e   :  { %1386 = vmatpush1.bf16.msra.mxu0 %v1385_v40  ;;  %1418 = vmatpush1.bf16.msra.mxu1 %v1417_v41  ;;  %v1437_v40 = vpack.c.bf16 %v640_v34, %v632_v33  ;;  %v646_v41 = vld [vmem:[#allocation8 + $0x3a0] sm:$0xff] }
 0x16f   :  { %1388 = vmatprep.subr.bf16.mxu0 %v1387_v44  ;;  %1420 = vmatprep.subr.bf16.mxu1 %v1419_v45  ;;  %v654_v44 = vld [vmem:[#allocation8 + $0x3e0] sm:$0xff]  ;;  %v648_v45 = vld [vmem:[#allocation8 + $0x3b0] sm:$0xff] }
 0x170   :  { %v1409_v47 = vpack.c.bf16 %v654_v44, %v646_v41  ;;  %v1441_v48 = vpack.c.bf16 %v656_v46, %v648_v45 }
 0x172   :  { %1390 = vmatpush1.bf16.msra.mxu0 %v1389_v52  ;;  %1422 = vmatpush1.bf16.msra.mxu1 %v1421_v53  ;;  %v666_v52 = vsub.s32 1, %v1661_v3  ;;  %v674_v53 = vsub.s32 3, %v1661_v3 }
 0x173   :  { %1392 = vmatprep.subr.bf16.mxu0 %v1391_v56  ;;  %1424 = vmatprep.subr.bf16.mxu1 %v1423_v57 }
 0x174   :  { %v667_v56 = vrot.slane %v658_v51, %v666_v52  ;;  %v675_v57 = vrot.slane %v658_v51, %v674_v53 }
 0x176   :  { %1394 = vmatpush1.bf16.msra.mxu0 %v1393_v0  ;;  %1426 = vmatpush1.bf16.msra.mxu1 %v1425_v1 }
 0x177   :  { %1396 = vmatprep.subr.bf16.mxu0 %v1395_v5  ;;  %1428 = vmatprep.subr.bf16.mxu1 %v1427_v6 }
 0x17a   :  { %1398 = vmatpush1.bf16.msra.mxu0 %v1397_v13  ;;  %1430 = vmatpush1.bf16.msra.mxu1 %v1429_v14  ;;  %v683_v13 = vrot.slane %v658_v51, %v682_v9  ;;  %v691_v14 = vrot.slane %v658_v51, %v690_v10 }
 0x17b   :  { %1400 = vmatprep.subr.bf16.mxu0 %v1399_v17  ;;  %1432 = vmatprep.subr.bf16.mxu1 %v1431_v19 }
 0x17e   :  { %1402 = vmatpush1.bf16.msra.mxu0 %v1401_v26  ;;  %1434 = vmatpush1.bf16.msra.mxu1 %v1433_v27 }
 0x17f   :  { %1404 = vmatprep.subr.bf16.mxu0 %v1403_v30  ;;  %1436 = vmatprep.subr.bf16.mxu1 %v1435_v32 }
 0x182   :  { %1406 = vmatpush1.bf16.msra.mxu0 %v1405_v39  ;;  %1438 = vmatpush1.bf16.msra.mxu1 %v1437_v40 }
 0x183   :  { %1408 = vmatprep.subr.bf16.mxu0 %v1407_v42  ;;  %1440 = vmatprep.subr.bf16.mxu1 %v1439_v43 }
 0x186   :  { %1410 = vmatpush1.bf16.msra.mxu0 %v1409_v47  ;;  %1442 = vmatpush1.bf16.msra.mxu1 %v1441_v48 }
 0x189   :  { %907 = vmatmul.mubr.f32.vlgmr.msra.gmra.mrb[6].mxu0 %v1670_v31  ;;  %978 = vmatmul.mubr.f32.vlgmr.msra.gmra.mrb[6].mxu1 %v1670_v31 }
 0x23c   :  { %v766_v58 = vpop.f32.mrb[4].mxu0  ;;  %v837_v59 = vpop.f32.mrb[4].mxu1 }
 0x23d   :  { %v767_v60 = vadd.f32 %v766_v58, %v663_v54  ;;  %v838_v31 = vadd.f32 %v837_v59, %v671_v55  ;;  %v768_v61 = vpop.f32.mrb[5].mxu0  ;;  %v839_v62 = vpop.f32.mrb[5].mxu1 }
 0x23e   :  { %v769_v63 = vadd.f32 %v768_v61, %v667_v56  ;;  %v840_v0 = vadd.f32 %v839_v62, %v675_v57 }
 0x240   :  { %v992_v1 = vcombine.low %v767_v60, %v769_v63  ;;  %v993_v2 = vcombine.low %v838_v31, %v840_v0 }
 0x242   :  { %v1000_v4 = vrot.slane %v992_v1, %v1664_v18  ;;  %v1007_v5 = vrot.slane %v993_v2, %v1664_v18 }
 0x244   :  { %v1008_v6 = vcombine.low %v1000_v4, %v1007_v5 }
 0x246   :  { %1028 = vst [vmem:[#allocation10] sm:$0xff] %v1008_v6 }
 0x25c   :  { %v908_v15 = vpop.f32.mrb[6].mxu0  ;;  %v979_v16 = vpop.f32.mrb[6].mxu1 }
 0x25d   :  { %v909_v17 = vadd.f32 %v908_v15, %v679_v11  ;;  %v980_v19 = vadd.f32 %v979_v16, %v687_v12  ;;  %v910_v20 = vpop.f32.mrb[7].mxu0  ;;  %v981_v21 = vpop.f32.mrb[7].mxu1 }
 0x25e   :  { %v911_v22 = vadd.f32 %v910_v20, %v683_v13  ;;  %v982_v23 = vadd.f32 %v981_v21, %v691_v14 }
 0x260   :  { %v1009_v24 = vcombine.low %v909_v17, %v911_v22  ;;  %v1010_v25 = vcombine.low %v980_v19, %v982_v23 }
 0x262   :  { %v1017_v26 = vrot.slane %v1009_v24, %v1664_v18  ;;  %v1024_v3 = vrot.slane %v1010_v25, %v1664_v18 }
 0x264   :  { %v1025_v27 = vcombine.low %v1017_v26, %v1024_v3 }
 0x266   :  { %1029 = vst [vmem:[#allocation10 + $0x8] sm:$0xff] %v1025_v27 }
 0x267   :  { %1553 = shalt.err (!%p1550_p8)
}
 0x268   :  { %s1554_s22 = scalar_lea.hbm %s1708_s5, 256 }
 0x269   :  { %p1555_p9 = scmp.ne.s32.totalorder %s1708_s5, %s1554_s22  ;;  %p1558_p10 = scmp.lt.u32.totalorder %s1554_s22, %s1708_s5 }
 0x26b   :  { %p1560_p11 = pnand %p1558_p10, %p1555_p9 }
 0x26d   :  { %1563 = shalt.err (!%p1560_p11)
}
 0x26e   :  { %1039 = dma.vmem_to_hbm [thread:$0]  %s1037_s17, 256, %s1708_s5, [#allocation4]  }
 0x26f   :  { %1570 = dma.done.wait [#allocation4], 256  }
 0x270   :  { %1571 = vsyncadd [#allocation4], 4294967040 }
 0x271   :  { %1043 = vsyncpa [#allocation3], 1 }
 0x272   :  { %1044 = vsyncpa [#allocation6], 1 }
 0x273   :  { %1045 = vsyncpa [#allocation9], 1 }
 0x274   :  { %1046 = vsyncpa [#allocation4], 1 }

</bundles_post_ra>
